<compile_context>
chip_gen: v7x
topology: tpu7x:2x2x1
jax: 0.10.0
libtpu: 0.0.40
codegen_flags: <defaults>
</compile_context>

<pallas_src>
import numpy as np

import jax
import jax.numpy as jnp
from jax import lax
from jax.experimental import pallas as pl
from jax.experimental.pallas import tpu as pltpu


def _round_up(x, m):
    return ((x + m - 1) // m) * m


def _vmem_limit_bytes():
    """Scoped VMEM limit to request (~3/4 of physical: 96 MiB v5e/v6e, 48 MiB v7x)."""
    try:
        phys = int(pltpu.get_tpu_info().vmem_capacity_bytes)
    except Exception:
        phys = 64 * 1024 * 1024   # v7x has the smallest per-core VMEM; be conservative
    return (3 * phys) // 4


def _layer_tiling(d, cap):
    """Balanced per-layer feature tiling.

    Returns (tile, n_tiles, padded_d) with `tile` a multiple of 128, <= cap,
    and padded_d - d < n_tiles * 128, so a narrow dense head never streams a
    full global tile of zeros through HBM / the MXU."""
    d128 = _round_up(max(int(d), 1), 128)
    n_t = pl.cdiv(d128, cap)
    tile = _round_up(pl.cdiv(d128, n_t), 128)
    n_t = pl.cdiv(d128, tile)
    return tile, n_t, tile * n_t


def _pick_tile_cap(b, dims, dtype_bytes, budget_bytes):
    """Largest tile-width cap whose double-buffered VMEM footprint fits budget.

    Footprint = sum_i 2 * B * tile_i * dtype_bytes (every layer is its own
    double-buffered operand) + 2 * B^2 * 4 for the resident f32 gram block."""
    cap = 16384
    while cap > 128:
        foot = 2 * b * b * 4
        for d in dims:
            tile, _, _ = _layer_tiling(d, cap)
            foot += 2 * b * tile * dtype_bytes
        if foot <= budget_bytes:
            break
        cap //= 2
    return cap


def _build_schedule(n_tiles, num_splits):
    """Flat per-core tile schedule (no dead steps for ragged layer widths).

    Each layer's column tiles are split contiguously across `num_splits`
    cores.  A core that owns zero tiles of a layer still gets one inert
    "dummy" step so it writes a (centered) zero partial for that layer;
    trailing "filler" steps (invalid, pinned to the core's last layer)
    equalise the per-core step counts into a rectangular grid."""
    m = len(n_tiles)
    s = num_splits
    lay_off = np.zeros((s, m), np.int32)   # first column-tile owned by (core, layer)
    cnt = np.zeros((s, m), np.int32)       # real tiles owned by (core, layer)
    for i, n in enumerate(n_tiles):
        base, rem = divmod(int(n), s)
        start = 0
        for c in range(s):
            k = base + (1 if c < rem else 0)
            lay_off[c, i] = start if k > 0 else 0
            cnt[c, i] = k
            start += k
    lay_first = np.zeros((s, m), np.int32)
    lay_last = np.zeros((s, m), np.int32)
    per_core = []
    for c in range(s):
        layer_seq, valid_seq, first_seq, last_seq = [], [], [], []
        for i in range(m):
            k = int(cnt[c, i])
            steps = max(k, 1)
            lay_first[c, i] = len(layer_seq)
            lay_last[c, i] = len(layer_seq) + steps - 1
            layer_seq += [i] * steps
            valid_seq += [1] * k + [0] * (steps - k)
            first_seq += [1] + [0] * (steps - 1)
            last_seq += [0] * (steps - 1) + [1]
        per_core.append((layer_seq, valid_seq, first_seq, last_seq))
    t_steps = max(len(p[0]) for p in per_core)
    tile_layer = np.zeros((s, t_steps), np.int32)
    tile_first = np.zeros((s, t_steps), np.int32)
    tile_last = np.zeros((s, t_steps), np.int32)
    tile_valid = np.zeros((s, t_steps), np.int32)
    for c, (layer_seq, valid_seq, first_seq, last_seq) in enumerate(per_core):
        pad = t_steps - len(layer_seq)
        tile_layer[c] = layer_seq + [layer_seq[-1]] * pad   # filler: pinned + inert
        tile_valid[c] = valid_seq + [0] * pad
        tile_first[c] = first_seq + [0] * pad
        tile_last[c] = last_seq + [0] * pad
    return (tile_layer, tile_first, tile_last, tile_valid,
            lay_first, lay_last, lay_off, t_steps)


def _make_x_index_map(i):
    """Column-tile selector for layer i: walks this core's owned tiles while
    the schedule is inside layer i and stays pinned (no re-DMA) otherwise."""
    def x_index_map(c, t, tile_layer, tile_first, tile_last, tile_valid,
                    lay_first, lay_last, lay_off):
        first = lay_first[c, i]
        local = jnp.clip(t, first, lay_last[c, i]) - first
        return (0, local + lay_off[c, i])
    return x_index_map


def _out_index_map(c, t, tile_layer, tile_first, tile_last, tile_valid,
                   lay_first, lay_last, lay_off):
    return (c, tile_layer[c, t], 0, 0)


def _make_gram_kernel(m_layers, b):
    def kernel(*refs):
        (tile_layer, tile_first, tile_last, tile_valid,
         lay_first, lay_last, lay_off) = refs[:7]
        x_refs = refs[7:7 + m_layers]
        kh_ref = refs[7 + m_layers]

        c = pl.program_id(0)
        t = pl.program_id(1)
        layer = tile_layer[c, t]
        is_first = tile_first[c, t] == 1
        is_last = tile_last[c, t] == 1
        valid = tile_valid[c, t] == 1

        @pl.when(is_first)
        def _init():
            kh_ref[...] = jnp.zeros_like(kh_ref)

        # Unrolled layer select: only the active layer's tile is read; all
        # other operands' blocks stay pinned by their index_map (no re-DMA).
        for i in range(m_layers):
            @pl.when(jnp.logical_and(valid, layer == i))
            def _accumulate(i=i):
                x = x_refs[i][...]                 # (B, tile_d_i), bf16/f32
                kh_ref[...] += lax.dot_general(    # MXU, f32 accumulation
                    x, x, (((1,), (1,)), ((), ())),
                    preferred_element_type=jnp.float32)

        @pl.when(is_last)
        def _finalize():
            kmat = kh_ref[...]
            row = lax.broadcasted_iota(jnp.int32, (b, b), 0)
            col = lax.broadcasted_iota(jnp.int32, (b, b), 1)
            kmat = jnp.where(row == col, 0.0, kmat)            # K.fill_diagonal_(0.0)
            # H K H with H = I - 11^T/B == mean subtraction (no B^3 matmuls).
            # Diag-zero and centering are both linear, so per-split partial
            # grams can be finalized here and summed outside the kernel.
            mean_cols = jnp.mean(kmat, axis=0, keepdims=True)  # (1, B)
            mean_rows = jnp.mean(kmat, axis=1, keepdims=True)  # (B, 1)
            mean_all = jnp.mean(mean_cols, keepdims=True)      # overall mean, no 2nd BxB pass
            kh_ref[...] = kmat - mean_cols - mean_rows + mean_all
    return kernel


def fused_centered_grams(outputs, *, compute_dtype=jnp.bfloat16, tile_cap=None,
                         num_splits=2):
    """One pallas_call computing all M centered grams Khat_i -> [M, B, B] f32."""
    b = outputs[0].shape[0]
    m_layers = len(outputs)
    feats = [o.reshape(b, -1) for o in outputs]

    # bf16 streaming halves HBM traffic and the VMEM tile footprint; the MXU
    # accumulates in f32 either way.  Pass compute_dtype=jnp.float32 for exact
    # torch-f32 parity (and to avoid a standalone cast copy when the producer
    # network is not jitted together with this loss).
    # TODO(synk): expose precision=lax.Precision.HIGHEST for strict f32 parity
    # at very large D if DEFAULT-precision drift ever matters.
    if compute_dtype is None:
        dtype = jnp.result_type(*[f.dtype for f in feats])
    else:
        dtype = jnp.dtype(compute_dtype)
    dtype_bytes = dtype.itemsize

    vmem_limit = _vmem_limit_bytes()
    if tile_cap is None:
        tile_cap = _pick_tile_cap(b, [f.shape[1] for f in feats], dtype_bytes,
                                  int(vmem_limit * 0.85))
    tile_cap = max(128, _round_up(int(tile_cap), 128))
    # TODO(synk): for very large M where per-layer double-buffers overflow even
    # the smallest cap, fall back to a manual double-buffered pl.ANY DMA path.

    xs, n_tiles, in_specs = [], [], []
    for idx, f in enumerate(feats):
        d = f.shape[1]
        tile, n_t, d_pad = _layer_tiling(d, tile_cap)
        f = f.astype(dtype)
        if d_pad != d:
            # Zero padding contributes nothing to X @ X^T -> no masking needed.
            f = jnp.pad(f, ((0, 0), (0, d_pad - d)))
        xs.append(f)
        n_tiles.append(n_t)
        in_specs.append(pl.BlockSpec((b, tile), _make_x_index_map(idx)))

    (tile_layer, tile_first, tile_last, tile_valid,
     lay_first, lay_last, lay_off, t_steps) = _build_schedule(n_tiles, num_splits)

    flops = sum(2 * b * b * int(x.shape[1]) for x in xs)
    bytes_accessed = (sum(b * int(x.shape[1]) for x in xs) * dtype_bytes
                      + num_splits * m_layers * b * b * 4)

    partials = pl.pallas_call(
        _make_gram_kernel(m_layers, b),
        out_shape=jax.ShapeDtypeStruct((num_splits, m_layers, b, b), jnp.float32),
        grid_spec=pltpu.PrefetchScalarGridSpec(
            num_scalar_prefetch=7,
            grid=(num_splits, t_steps),
            in_specs=in_specs,
            out_specs=pl.BlockSpec((None, None, b, b), _out_index_map),
        ),
        compiler_params=pltpu.CompilerParams(
            # Split axis shards feature tiles across the two TensorCores on
            # v7x (harmless on single-core v5e/v6e); the tile axis is the
            # per-layer reduction and must stay "arbitrary".
            dimension_semantics=("parallel", "arbitrary"),
            vmem_limit_bytes=vmem_limit),
        cost_estimate=pl.CostEstimate(flops=flops, transcendentals=0,
                                      bytes_accessed=bytes_accessed),
    )(jnp.asarray(tile_layer), jnp.asarray(tile_first), jnp.asarray(tile_last),
      jnp.asarray(tile_valid), jnp.asarray(lay_first), jnp.asarray(lay_last),
      jnp.asarray(lay_off), *xs)

    if num_splits == 1:
        return partials[0]
    # diag-zero + HKH centering are linear -> summing finalized partials is exact.
    return jnp.sum(partials, axis=0)


def _pairwise_hsic_kernel(kflat_ref, out_ref):
    """out[i, j] = |sum(Khat_i * Khat_j)| accumulated over B^2 column chunks."""
    k = pl.program_id(0)

    @pl.when(k == 0)
    def _init():
        out_ref[...] = jnp.zeros_like(out_ref)

    kf = kflat_ref[...]
    out_ref[...] += lax.dot_general(kf, kf, (((1,), (1,)), ((), ())),
                                    preferred_element_type=jnp.float32)

    @pl.when(k == pl.num_programs(0) - 1)
    def _finalize():
        out_ref[...] = jnp.abs(out_ref[...])


def pairwise_hsic(kflat, *, tile_n=None):
    m, n = kflat.shape
    vmem_limit = _vmem_limit_bytes()
    if tile_n is None:
        # Largest power-of-two-halving divisor of B^2 that is a multiple of 128
        # and fits the double-buffered VMEM budget; fall back to the full row
        # (always legal) for tiny B.
        budget = int(vmem_limit * 0.85) - 2 * m * m * 4
        tile_n = n
        while (2 * m * tile_n * 4 > budget and tile_n % 2 == 0
               and (tile_n // 2) % 128 == 0):
            tile_n //= 2
    assert n % tile_n == 0, (n, tile_n)
    return pl.pallas_call(
        _pairwise_hsic_kernel,
        out_shape=jax.ShapeDtypeStruct((m, m), jnp.float32),
        grid_spec=pltpu.PrefetchScalarGridSpec(
            num_scalar_prefetch=0,
            grid=(n // tile_n,),
            in_specs=[pl.BlockSpec((m, tile_n), lambda k: (0, k))],
            out_specs=pl.BlockSpec((m, m), lambda k: (0, 0)),
        ),
        compiler_params=pltpu.CompilerParams(
            dimension_semantics=("arbitrary",),
            vmem_limit_bytes=vmem_limit),
        cost_estimate=pl.CostEstimate(flops=2 * m * m * n, transcendentals=0,
                                      bytes_accessed=m * n * 4 + m * m * 4),
    )(kflat)


def cka_loss(outputs, *, compute_dtype=jnp.bfloat16, tile_cap=None,
             num_splits=2, pair_tile=None):
    """Pallas implementation of CKA_Loss.forward.

    `outputs` is a list of M per-layer feature arrays, each [B, ...].
    Returns (hsic_visual [M, M], l scalar) like the torch module.
    """
    m = len(outputs)
    khats = fused_centered_grams(outputs, compute_dtype=compute_dtype,
                                 tile_cap=tile_cap, num_splits=num_splits)
    b = khats.shape[1]
    kflat = khats.reshape(m, b * b)                        # contiguous -> free
    hsic_full = pairwise_hsic(kflat, tile_n=pair_tile)     # [M, M]
    # Tiny M x M glue in plain JAX (normalisation, masking, totals).
    diag = jnp.diagonal(hsic_full)                         # HSIC(K_i, K_i)
    denom = jnp.sqrt(diag[:, None] * diag[None, :] + 1e-6)
    ratio = hsic_full / denom
    row = lax.broadcasted_iota(jnp.int32, (m, m), 0)
    col = lax.broadcasted_iota(jnp.int32, (m, m), 1)
    hsic_matrix = ratio * (col < row).astype(jnp.float32)  # only j < i filled
    l = jnp.sum(jnp.abs(hsic_matrix))
    hsic_visual = hsic_matrix + hsic_matrix.T + jnp.eye(m, dtype=jnp.float32)
    return hsic_visual, l


def _reference(outputs):
    """Pure-JAX mirror of the torch code, for a correctness check."""
    m = len(outputs)
    b = outputs[0].shape[0]

    def hsic(K, L):
        H = jnp.eye(b) - jnp.ones((b, b)) / b
        return jnp.abs(jnp.sum((H @ K @ H) * (H @ L @ H)))

    grams = []
    for o in outputs:
        X = o.reshape(b, -1).astype(jnp.float32)
        K = X @ X.T
        grams.append(K * (1.0 - jnp.eye(b)))
    hsic_matrix = jnp.zeros((m, m))
    for i in range(m):
        hk = hsic(grams[i], grams[i])
        for j in range(i):
            hl = hsic(grams[j], grams[j])
            v = hsic(grams[i], grams[j]) / jnp.sqrt(hk * hl + 1e-6)
            hsic_matrix = hsic_matrix.at[i, j].set(v)
    l = jnp.sum(jnp.abs(hsic_matrix))
    return hsic_matrix + hsic_matrix.T + jnp.eye(m), l


if __name__ == "__main__":
    key = jax.random.PRNGKey(0)
    k1, k2, k3 = jax.random.split(key, 3)
    B = 8
    # Synthetic per-layer activations (two NCHW conv maps + one dense feature).
    outputs = [
        jax.random.normal(k1, (B, 6, 8, 8), dtype=jnp.float32),   # D = 384
        jax.random.normal(k2, (B, 8, 4, 4), dtype=jnp.float32),   # D = 128
        jax.random.normal(k3, (B, 64), dtype=jnp.float32),        # D = 64
    ]
    ref_vis, ref_l = _reference(outputs)

    # 1) Default path: bf16 streaming, auto tile cap, 2-way core split.
    vis_bf16, l_bf16 = jax.block_until_ready(cka_loss(outputs))
    assert jnp.allclose(vis_bf16, ref_vis, rtol=5e-2, atol=5e-2), (vis_bf16, ref_vis)
    assert jnp.allclose(l_bf16, ref_l, rtol=5e-2, atol=5e-2), (l_bf16, ref_l)

    # 2) f32 streaming with a tiny tile cap: exercises the multi-tile
    #    reduction, ragged per-core schedule, dummy and filler steps.
    vis_f32, l_f32 = jax.block_until_ready(
        cka_loss(outputs, compute_dtype=jnp.float32, tile_cap=128, num_splits=2))
    assert jnp.allclose(vis_f32, ref_vis, rtol=1e-4, atol=1e-4), (vis_f32, ref_vis)
    assert jnp.allclose(l_f32, ref_l, rtol=1e-4, atol=1e-4), (l_f32, ref_l)

    # 3) f32 streaming, single split (v5e/v6e-style), default tiles.
    vis_one, l_one = jax.block_until_ready(
        cka_loss(outputs, compute_dtype=jnp.float32, num_splits=1))
    assert jnp.allclose(vis_one, ref_vis, rtol=1e-4, atol=1e-4)
    assert jnp.allclose(l_one, ref_l, rtol=1e-4, atol=1e-4)

    # 4) B=16 config with a forced 128-column pairwise tile: exercises the
    #    tiled B^2 reduction (accumulating output block) in pairwise_hsic.
    kk = jax.random.split(jax.random.PRNGKey(0), 3)
    B2 = 16
    outputs2 = [
        jax.random.normal(kk[0], (B2, 4, 8, 8), dtype=jnp.float32),
        jax.random.normal(kk[1], (B2, 8, 4, 4), dtype=jnp.float32),
        jax.random.normal(kk[2], (B2, 64), dtype=jnp.float32),
    ]
    ref_vis2, ref_l2 = _reference(outputs2)
    vis2, l2 = jax.block_until_ready(
        cka_loss(outputs2, compute_dtype=jnp.float32, pair_tile=128))
    assert jnp.allclose(vis2, ref_vis2, rtol=1e-4, atol=1e-4)
    assert jnp.allclose(l2, ref_l2, rtol=1e-4, atol=1e-4)

    print("KERNEL_OK")
</pallas_src>

<mosaic_0001>
module attributes {stable_mosaic.version = 11 : i64} {
  func.func @kernel(%arg0: i32, %arg1: i32, %arg2: memref<2x3xi32, #tpu.memory_space<smem>>, %arg3: memref<2x3xi32, #tpu.memory_space<smem>>, %arg4: memref<2x3xi32, #tpu.memory_space<smem>>, %arg5: memref<2x3xi32, #tpu.memory_space<smem>>, %arg6: memref<2x3xi32, #tpu.memory_space<smem>>, %arg7: memref<2x3xi32, #tpu.memory_space<smem>>, %arg8: memref<2x3xi32, #tpu.memory_space<smem>>, %arg9: memref<8x384xbf16, #tpu.memory_space<vmem>>, %arg10: memref<8x128xbf16, #tpu.memory_space<vmem>>, %arg11: memref<8x128xbf16, #tpu.memory_space<vmem>>, %arg12: memref<1x1x8x8xf32, #tpu.memory_space<vmem>>) attributes {dimension_semantics = [#tpu.dimension_semantics<parallel>, #tpu.dimension_semantics<arbitrary>], iteration_bounds = array<i64: 2, 3>, scalar_prefetch = 7 : i64, scratch_operands = 0 : i64, tpu.core_type = #tpu.core_type<tc>, window_params = [{transform_indices = @transform_0, window_bounds = array<i64: 8, 384>}, {transform_indices = @transform_1, window_bounds = array<i64: 8, 128>}, {transform_indices = @transform_2, window_bounds = array<i64: 8, 128>}, {transform_indices = @transform_3, window_bounds = array<i64: 1, 1, 8, 8>}]} {
    %0 = arith.index_cast %arg0 : i32 to index
    %1 = arith.index_cast %arg1 : i32 to index
    %2 = memref.load %arg2[%0, %1] : memref<2x3xi32, #tpu.memory_space<smem>>
    %3 = arith.index_cast %arg0 : i32 to index
    %4 = arith.index_cast %arg1 : i32 to index
    %5 = memref.load %arg3[%3, %4] : memref<2x3xi32, #tpu.memory_space<smem>>
    %c1_i32 = arith.constant 1 : i32
    %6 = arith.cmpi eq, %5, %c1_i32 : i32
    %7 = arith.index_cast %arg0 : i32 to index
    %8 = arith.index_cast %arg1 : i32 to index
    %9 = memref.load %arg4[%7, %8] : memref<2x3xi32, #tpu.memory_space<smem>>
    %c1_i32_0 = arith.constant 1 : i32
    %10 = arith.cmpi eq, %9, %c1_i32_0 : i32
    %11 = arith.index_cast %arg0 : i32 to index
    %12 = arith.index_cast %arg1 : i32 to index
    %13 = memref.load %arg5[%11, %12] : memref<2x3xi32, #tpu.memory_space<smem>>
    %c1_i32_1 = arith.constant 1 : i32
    %14 = arith.cmpi eq, %13, %c1_i32_1 : i32
    %15 = arith.extui %6 : i1 to i32
    %c0_i32 = arith.constant 0 : i32
    %16 = arith.cmpi ne, %15, %c0_i32 : i32
    scf.if %16 {
      %cst = arith.constant 0.000000e+00 : f32
      %31 = vector.broadcast %cst : f32 to vector<8x8xf32>
      %c0 = arith.constant 0 : index
      %c0_8 = arith.constant 0 : index
      %c0_9 = arith.constant 0 : index
      %c0_10 = arith.constant 0 : index
      %32 = vector.load %arg12[%c0, %c0_8, %c0_9, %c0_10] : memref<1x1x8x8xf32, #tpu.memory_space<vmem>>, vector<1x1x8x8xf32>
      %33 = vector.shape_cast %32 : vector<1x1x8x8xf32> to vector<8x8xf32>
      %34 = vector.shape_cast %31 : vector<8x8xf32> to vector<1x1x8x8xf32>
      tpu.vector_store %arg12[%c0, %c0_8, %c0_9, %c0_10], %34 {strides = array<i32>} : memref<1x1x8x8xf32, #tpu.memory_space<vmem>>, vector<1x1x8x8xf32>,
    } else {
    }
    %c0_i32_2 = arith.constant 0 : i32
    %17 = arith.cmpi eq, %2, %c0_i32_2 : i32
    %18 = arith.andi %14, %17 : i1
    %19 = arith.extui %18 : i1 to i32
    %c0_i32_3 = arith.constant 0 : i32
    %20 = arith.cmpi ne, %19, %c0_i32_3 : i32
    scf.if %20 {
      %c0 = arith.constant 0 : index
      %c0_8 = arith.constant 0 : index
      %31 = vector.load %arg9[%c0, %c0_8] : memref<8x384xbf16, #tpu.memory_space<vmem>>, vector<8x384xbf16>
      %c0_9 = arith.constant 0 : index
      %c0_10 = arith.constant 0 : index
      %c0_11 = arith.constant 0 : index
      %c0_12 = arith.constant 0 : index
      %32 = vector.load %arg12[%c0_9, %c0_10, %c0_11, %c0_12] : memref<1x1x8x8xf32, #tpu.memory_space<vmem>>, vector<1x1x8x8xf32>
      %33 = vector.shape_cast %32 : vector<1x1x8x8xf32> to vector<8x8xf32>
      %cst = arith.constant dense<0.000000e+00> : vector<8x8xf32>
      %34 = tpu.matmul %31, %31, %cst {dimension_numbers = #tpu.dot_dimension_numbers<[1], [1], [0], [0], [0, 0, 1, 0], [], []>} : vector<8x384xbf16>, vector<8x384xbf16>, vector<8x8xf32> -> vector<8x8xf32>
      %35 = arith.addf %33, %34 : vector<8x8xf32>
      %c0_13 = arith.constant 0 : index
      %c0_14 = arith.constant 0 : index
      %c0_15 = arith.constant 0 : index
      %c0_16 = arith.constant 0 : index
      %36 = vector.load %arg12[%c0_13, %c0_14, %c0_15, %c0_16] : memref<1x1x8x8xf32, #tpu.memory_space<vmem>>, vector<1x1x8x8xf32>
      %37 = vector.shape_cast %36 : vector<1x1x8x8xf32> to vector<8x8xf32>
      %38 = vector.shape_cast %35 : vector<8x8xf32> to vector<1x1x8x8xf32>
      tpu.vector_store %arg12[%c0_13, %c0_14, %c0_15, %c0_16], %38 {strides = array<i32>} : memref<1x1x8x8xf32, #tpu.memory_space<vmem>>, vector<1x1x8x8xf32>,
    } else {
    }
    %c1_i32_4 = arith.constant 1 : i32
    %21 = arith.cmpi eq, %2, %c1_i32_4 : i32
    %22 = arith.andi %14, %21 : i1
    %23 = arith.extui %22 : i1 to i32
    %c0_i32_5 = arith.constant 0 : i32
    %24 = arith.cmpi ne, %23, %c0_i32_5 : i32
    scf.if %24 {
      %c0 = arith.constant 0 : index
      %c0_8 = arith.constant 0 : index
      %31 = vector.load %arg10[%c0, %c0_8] : memref<8x128xbf16, #tpu.memory_space<vmem>>, vector<8x128xbf16>
      %c0_9 = arith.constant 0 : index
      %c0_10 = arith.constant 0 : index
      %c0_11 = arith.constant 0 : index
      %c0_12 = arith.constant 0 : index
      %32 = vector.load %arg12[%c0_9, %c0_10, %c0_11, %c0_12] : memref<1x1x8x8xf32, #tpu.memory_space<vmem>>, vector<1x1x8x8xf32>
      %33 = vector.shape_cast %32 : vector<1x1x8x8xf32> to vector<8x8xf32>
      %cst = arith.constant dense<0.000000e+00> : vector<8x8xf32>
      %34 = tpu.matmul %31, %31, %cst {dimension_numbers = #tpu.dot_dimension_numbers<[1], [1], [0], [0], [0, 0, 1, 0], [], []>} : vector<8x128xbf16>, vector<8x128xbf16>, vector<8x8xf32> -> vector<8x8xf32>
      %35 = arith.addf %33, %34 : vector<8x8xf32>
      %c0_13 = arith.constant 0 : index
      %c0_14 = arith.constant 0 : index
      %c0_15 = arith.constant 0 : index
      %c0_16 = arith.constant 0 : index
      %36 = vector.load %arg12[%c0_13, %c0_14, %c0_15, %c0_16] : memref<1x1x8x8xf32, #tpu.memory_space<vmem>>, vector<1x1x8x8xf32>
      %37 = vector.shape_cast %36 : vector<1x1x8x8xf32> to vector<8x8xf32>
      %38 = vector.shape_cast %35 : vector<8x8xf32> to vector<1x1x8x8xf32>
      tpu.vector_store %arg12[%c0_13, %c0_14, %c0_15, %c0_16], %38 {strides = array<i32>} : memref<1x1x8x8xf32, #tpu.memory_space<vmem>>, vector<1x1x8x8xf32>,
    } else {
    }
    %c2_i32 = arith.constant 2 : i32
    %25 = arith.cmpi eq, %2, %c2_i32 : i32
    %26 = arith.andi %14, %25 : i1
    %27 = arith.extui %26 : i1 to i32
    %c0_i32_6 = arith.constant 0 : i32
    %28 = arith.cmpi ne, %27, %c0_i32_6 : i32
    scf.if %28 {
      %c0 = arith.constant 0 : index
      %c0_8 = arith.constant 0 : index
      %31 = vector.load %arg11[%c0, %c0_8] : memref<8x128xbf16, #tpu.memory_space<vmem>>, vector<8x128xbf16>
      %c0_9 = arith.constant 0 : index
      %c0_10 = arith.constant 0 : index
      %c0_11 = arith.constant 0 : index
      %c0_12 = arith.constant 0 : index
      %32 = vector.load %arg12[%c0_9, %c0_10, %c0_11, %c0_12] : memref<1x1x8x8xf32, #tpu.memory_space<vmem>>, vector<1x1x8x8xf32>
      %33 = vector.shape_cast %32 : vector<1x1x8x8xf32> to vector<8x8xf32>
      %cst = arith.constant dense<0.000000e+00> : vector<8x8xf32>
      %34 = tpu.matmul %31, %31, %cst {dimension_numbers = #tpu.dot_dimension_numbers<[1], [1], [0], [0], [0, 0, 1, 0], [], []>} : vector<8x128xbf16>, vector<8x128xbf16>, vector<8x8xf32> -> vector<8x8xf32>
      %35 = arith.addf %33, %34 : vector<8x8xf32>
      %c0_13 = arith.constant 0 : index
      %c0_14 = arith.constant 0 : index
      %c0_15 = arith.constant 0 : index
      %c0_16 = arith.constant 0 : index
      %36 = vector.load %arg12[%c0_13, %c0_14, %c0_15, %c0_16] : memref<1x1x8x8xf32, #tpu.memory_space<vmem>>, vector<1x1x8x8xf32>
      %37 = vector.shape_cast %36 : vector<1x1x8x8xf32> to vector<8x8xf32>
      %38 = vector.shape_cast %35 : vector<8x8xf32> to vector<1x1x8x8xf32>
      tpu.vector_store %arg12[%c0_13, %c0_14, %c0_15, %c0_16], %38 {strides = array<i32>} : memref<1x1x8x8xf32, #tpu.memory_space<vmem>>, vector<1x1x8x8xf32>,
    } else {
    }
    %29 = arith.extui %10 : i1 to i32
    %c0_i32_7 = arith.constant 0 : i32
    %30 = arith.cmpi ne, %29, %c0_i32_7 : i32
    scf.if %30 {
      %c0 = arith.constant 0 : index
      %c0_8 = arith.constant 0 : index
      %c0_9 = arith.constant 0 : index
      %c0_10 = arith.constant 0 : index
      %31 = vector.load %arg12[%c0, %c0_8, %c0_9, %c0_10] : memref<1x1x8x8xf32, #tpu.memory_space<vmem>>, vector<1x1x8x8xf32>
      %32 = vector.shape_cast %31 : vector<1x1x8x8xf32> to vector<8x8xf32>
      %33 = tpu.iota {dimensions = array<i32: 0>} : vector<8x8xi32>
      %34 = tpu.iota {dimensions = array<i32: 1>} : vector<8x8xi32>
      %35 = arith.cmpi eq, %33, %34 : vector<8x8xi32>
      %cst = arith.constant 0.000000e+00 : f32
      %36 = vector.broadcast %cst : f32 to vector<8x8xf32>
      %37 = arith.select %35, %36, %32 : vector<8x8xi1>, vector<8x8xf32>
      %cst_11 = arith.constant dense<0.000000e+00> : vector<8xf32>
      %38 = vector.multi_reduction <add>, %37, %cst_11 [0] : vector<8x8xf32> to vector<8xf32>
      %39 = vector.shape_cast %38 : vector<8xf32> to vector<1x8xf32>
      %cst_12 = arith.constant 8.000000e+00 : f32
      %40 = vector.broadcast %cst_12 : f32 to vector<1x8xf32>
      %41 = arith.divf %39, %40 : vector<1x8xf32>
      %cst_13 = arith.constant dense<0.000000e+00> : vector<8xf32>
      %42 = vector.multi_reduction <add>, %37, %cst_13 [1] : vector<8x8xf32> to vector<8xf32>
      %43 = vector.shape_cast %42 : vector<8xf32> to vector<8x1xf32>
      %cst_14 = arith.constant 8.000000e+00 : f32
      %44 = vector.broadcast %cst_14 : f32 to vector<8x1xf32>
      %45 = arith.divf %43, %44 : vector<8x1xf32>
      %46 = vector.shape_cast %41 : vector<1x8xf32> to vector<1x1x8xf32>
      %cst_15 = arith.constant dense<0.000000e+00> : vector<1xf32>
      %47 = vector.multi_reduction <add>, %46, %cst_15 [1, 2] : vector<1x1x8xf32> to vector<1xf32>
      %48 = vector.shape_cast %47 : vector<1xf32> to vector<1x1x1xf32>
      %49 = vector.extract %48[0, 0, 0] : f32 from vector<1x1x1xf32>
      %50 = vector.broadcast %49 : f32 to vector<1x1xf32>
      %cst_16 = arith.constant 8.000000e+00 : f32
      %51 = vector.broadcast %cst_16 : f32 to vector<1x1xf32>
      %52 = arith.divf %50, %51 : vector<1x1xf32>
      %53 = vector.broadcast %41 : vector<1x8xf32> to vector<8x8xf32>
      %54 = arith.subf %37, %53 : vector<8x8xf32>
      %55 = vector.broadcast %45 : vector<8x1xf32> to vector<8x8xf32>
      %56 = arith.subf %54, %55 : vector<8x8xf32>
      %57 = vector.broadcast %52 : vector<1x1xf32> to vector<8x8xf32>
      %58 = arith.addf %56, %57 : vector<8x8xf32>
      %c0_17 = arith.constant 0 : index
      %c0_18 = arith.constant 0 : index
      %c0_19 = arith.constant 0 : index
      %c0_20 = arith.constant 0 : index
      %59 = vector.load %arg12[%c0_17, %c0_18, %c0_19, %c0_20] : memref<1x1x8x8xf32, #tpu.memory_space<vmem>>, vector<1x1x8x8xf32>
      %60 = vector.shape_cast %59 : vector<1x1x8x8xf32> to vector<8x8xf32>
      %61 = vector.shape_cast %58 : vector<8x8xf32> to vector<1x1x8x8xf32>
      tpu.vector_store %arg12[%c0_17, %c0_18, %c0_19, %c0_20], %61 {strides = array<i32>} : memref<1x1x8x8xf32, #tpu.memory_space<vmem>>, vector<1x1x8x8xf32>,
    } else {
    }
    return
  }
  func.func @transform_0(%arg0: i32, %arg1: i32, %arg2: memref<2x3xi32, #tpu.memory_space<smem>>, %arg3: memref<2x3xi32, #tpu.memory_space<smem>>, %arg4: memref<2x3xi32, #tpu.memory_space<smem>>, %arg5: memref<2x3xi32, #tpu.memory_space<smem>>, %arg6: memref<2x3xi32, #tpu.memory_space<smem>>, %arg7: memref<2x3xi32, #tpu.memory_space<smem>>, %arg8: memref<2x3xi32, #tpu.memory_space<smem>>) -> (i32, i32) {
    %0 = arith.index_cast %arg0 : i32 to index
    %c0 = arith.constant 0 : index
    %1 = memref.load %arg6[%0, %c0] : memref<2x3xi32, #tpu.memory_space<smem>>
    %2 = arith.index_cast %arg0 : i32 to index
    %c0_0 = arith.constant 0 : index
    %3 = memref.load %arg7[%2, %c0_0] : memref<2x3xi32, #tpu.memory_space<smem>>
    %4 = arith.maxsi %1, %arg1 : i32
    %5 = arith.minsi %3, %4 : i32
    %6 = arith.subi %5, %1 : i32
    %7 = arith.index_cast %arg0 : i32 to index
    %c0_1 = arith.constant 0 : index
    %8 = memref.load %arg8[%7, %c0_1] : memref<2x3xi32, #tpu.memory_space<smem>>
    %9 = arith.addi %6, %8 : i32
    %c0_i32 = arith.constant 0 : i32
    %c0_i32_2 = arith.constant 0 : i32
    return %c0_i32, %9 : i32, i32
  }
  func.func @transform_1(%arg0: i32, %arg1: i32, %arg2: memref<2x3xi32, #tpu.memory_space<smem>>, %arg3: memref<2x3xi32, #tpu.memory_space<smem>>, %arg4: memref<2x3xi32, #tpu.memory_space<smem>>, %arg5: memref<2x3xi32, #tpu.memory_space<smem>>, %arg6: memref<2x3xi32, #tpu.memory_space<smem>>, %arg7: memref<2x3xi32, #tpu.memory_space<smem>>, %arg8: memref<2x3xi32, #tpu.memory_space<smem>>) -> (i32, i32) {
    %0 = arith.index_cast %arg0 : i32 to index
    %c1 = arith.constant 1 : index
    %1 = memref.load %arg6[%0, %c1] : memref<2x3xi32, #tpu.memory_space<smem>>
    %2 = arith.index_cast %arg0 : i32 to index
    %c1_0 = arith.constant 1 : index
    %3 = memref.load %arg7[%2, %c1_0] : memref<2x3xi32, #tpu.memory_space<smem>>
    %4 = arith.maxsi %1, %arg1 : i32
    %5 = arith.minsi %3, %4 : i32
    %6 = arith.subi %5, %1 : i32
    %7 = arith.index_cast %arg0 : i32 to index
    %c1_1 = arith.constant 1 : index
    %8 = memref.load %arg8[%7, %c1_1] : memref<2x3xi32, #tpu.memory_space<smem>>
    %9 = arith.addi %6, %8 : i32
    %c0_i32 = arith.constant 0 : i32
    %c0_i32_2 = arith.constant 0 : i32
    return %c0_i32, %9 : i32, i32
  }
  func.func @transform_2(%arg0: i32, %arg1: i32, %arg2: memref<2x3xi32, #tpu.memory_space<smem>>, %arg3: memref<2x3xi32, #tpu.memory_space<smem>>, %arg4: memref<2x3xi32, #tpu.memory_space<smem>>, %arg5: memref<2x3xi32, #tpu.memory_space<smem>>, %arg6: memref<2x3xi32, #tpu.memory_space<smem>>, %arg7: memref<2x3xi32, #tpu.memory_space<smem>>, %arg8: memref<2x3xi32, #tpu.memory_space<smem>>) -> (i32, i32) {
    %0 = arith.index_cast %arg0 : i32 to index
    %c2 = arith.constant 2 : index
    %1 = memref.load %arg6[%0, %c2] : memref<2x3xi32, #tpu.memory_space<smem>>
    %2 = arith.index_cast %arg0 : i32 to index
    %c2_0 = arith.constant 2 : index
    %3 = memref.load %arg7[%2, %c2_0] : memref<2x3xi32, #tpu.memory_space<smem>>
    %4 = arith.maxsi %1, %arg1 : i32
    %5 = arith.minsi %3, %4 : i32
    %6 = arith.subi %5, %1 : i32
    %7 = arith.index_cast %arg0 : i32 to index
    %c2_1 = arith.constant 2 : index
    %8 = memref.load %arg8[%7, %c2_1] : memref<2x3xi32, #tpu.memory_space<smem>>
    %9 = arith.addi %6, %8 : i32
    %c0_i32 = arith.constant 0 : i32
    %c0_i32_2 = arith.constant 0 : i32
    return %c0_i32, %9 : i32, i32
  }
  func.func @transform_3(%arg0: i32, %arg1: i32, %arg2: memref<2x3xi32, #tpu.memory_space<smem>>, %arg3: memref<2x3xi32, #tpu.memory_space<smem>>, %arg4: memref<2x3xi32, #tpu.memory_space<smem>>, %arg5: memref<2x3xi32, #tpu.memory_space<smem>>, %arg6: memref<2x3xi32, #tpu.memory_space<smem>>, %arg7: memref<2x3xi32, #tpu.memory_space<smem>>, %arg8: memref<2x3xi32, #tpu.memory_space<smem>>) -> (i32, i32, i32, i32) {
    %0 = arith.index_cast %arg0 : i32 to index
    %1 = arith.index_cast %arg1 : i32 to index
    %2 = memref.load %arg2[%0, %1] : memref<2x3xi32, #tpu.memory_space<smem>>
    %c0_i32 = arith.constant 0 : i32
    %c0_i32_0 = arith.constant 0 : i32
    %c0_i32_1 = arith.constant 0 : i32
    return %arg0, %2, %c0_i32, %c0_i32_0 : i32, i32, i32, i32
  }
}

</mosaic_0001>

<bundles_post_ra>
// kernel: tpu_custom_call.1
= control target key start
LH: loop header
LB: loop body
LE: loop exit
PB: predicated region body
PF: predicated region fallthrough
CT: control target
= control target key end

     0   :  { %s1552_s0 = inlined_call_operand.hbm [shape: s32[2,3], index: 0, kind: input, shape index: {}]   ;;  %s1553_s7 = inlined_call_operand.vmem [shape: bf16[8,384], index: 7, kind: input, shape index: {}]   ;;  %s1554_s8 = inlined_call_operand.vmem [shape: bf16[8,128], index: 8, kind: input, shape index: {}]   ;;  %s1555_s9 = inlined_call_operand.vmem [shape: bf16[8,128], index: 9, kind: input, shape index: {}]   ;;  %s1556_s10 = inlined_call_operand.hbm [shape: f32[2,3,8,8], index: 10, kind: output, shape index: {}]   ;;  %s1557_s1 = inlined_call_operand.vmem [shape: s32[2,3], index: 1, kind: input, shape index: {}]   ;;  %s1558_s2 = inlined_call_operand.hbm [shape: s32[2,3], index: 2, kind: input, shape index: {}]   ;;  %s1559_s3 = inlined_call_operand.hbm [shape: s32[2,3], index: 3, kind: input, shape index: {}]   ;;  %s1560_s4 = inlined_call_operand.hbm [shape: s32[2,3], index: 4, kind: input, shape index: {}]   ;;  %s1561_s5 = inlined_call_operand.hbm [shape: s32[2,3], index: 5, kind: input, shape index: {}]   ;;  %s1562_s6 = inlined_call_operand.hbm [shape: s32[2,3], index: 6, kind: input, shape index: {}]  }
   0x1   :  { %s1022_s15 = scalar_lea.hbm %s1552_s0, 32 }
   0x2   :  { %p1023_p0 = scmp.ne.s32.totalorder %s1552_s0, %s1022_s15  ;;  %p1026_p1 = scmp.lt.u32.totalorder %s1022_s15, %s1552_s0 }
   0x4   :  { %p1028_p2 = pnand %p1026_p1, %p1023_p0 }
   0x6   :  { %1031 = shalt.err (!%p1028_p2)  }
   0x7   :  { %s1192_s20 = smov [#allocation3]   ;;  %s17_s25 = sshll.u32 %s1557_s1, 4  ;;  %s18_s25 = int_to_ptr.vmem [resolvable:$true] %s17_s25 }
   0x8   :  { %16 = dma.hbm_to_smem %s1552_s0, 32, %s1192_s20, [#allocation2] }
   0x9   :  { %s1032_s26 = scalar_lea.vmem %s18_s25, 32  ;;  %p1037_p4 = scmp.lt.s32.totalorder %s18_s25, %s18_s25 }
   0xa   :  { %p1033_p3 = scmp.ne.s32.totalorder %s18_s25, %s1032_s26  ;;  %p1038_p5 = scmp.lt.s32.totalorder %s1032_s26, %s1032_s26 }
   0xc   :  { %p1039_p6 = por %p1038_p5, %p1037_p4 }
   0xe   :  { %p1040_p7 = pnand %p1039_p6, %p1033_p3 }
  0x10   :  { %1043 = shalt.err (!%p1040_p7)  }
  0x11   :  { %s1193_s27 = smov [#allocation4]   ;;  %s1044_s30 = scalar_lea.hbm %s1558_s2, 32 }
  0x12   :  { %20 = dma.vmem_to_smem %s18_s25, 32, %s1193_s27, [#allocation2] }
  0x13   :  { %p1045_p8 = scmp.ne.s32.totalorder %s1558_s2, %s1044_s30  ;;  %p1048_p9 = scmp.lt.u32.totalorder %s1044_s30, %s1558_s2 }
  0x15   :  { %p1050_p10 = pnand %p1048_p9, %p1045_p8 }
  0x17   :  { %1053 = shalt.err (!%p1050_p10)  }
  0x18   :  { %s1194_s13 = smov [#allocation5]   ;;  %s1054_s18 = scalar_lea.hbm %s1559_s3, 32 }
  0x19   :  { %22 = dma.hbm_to_smem %s1558_s2, 32, %s1194_s13, [#allocation2] }
  0x1a   :  { %p1055_p11 = scmp.ne.s32.totalorder %s1559_s3, %s1054_s18  ;;  %p1058_p12 = scmp.lt.u32.totalorder %s1054_s18, %s1559_s3 }
  0x1c   :  { %p1060_p13 = pnand %p1058_p12, %p1055_p11 }
  0x1e   :  { %1063 = shalt.err (!%p1060_p13)  }
  0x1f   :  { %s1195_s23 = smov [#allocation6]   ;;  %s1064_s27 = scalar_lea.hbm %s1560_s4, 32 }
  0x20   :  { %24 = dma.hbm_to_smem %s1559_s3, 32, %s1195_s23, [#allocation2] }
  0x21   :  { %p1065_p0 = scmp.ne.s32.totalorder %s1560_s4, %s1064_s27  ;;  %p1068_p1 = scmp.lt.u32.totalorder %s1064_s27, %s1560_s4 }
  0x23   :  { %p1070_p2 = pnand %p1068_p1, %p1065_p0 }
  0x25   :  { %1073 = shalt.err (!%p1070_p2)  }
  0x26   :  { %s1196_s0 = smov [#allocation7]   ;;  %s1074_s14 = scalar_lea.hbm %s1561_s5, 32 }
  0x27   :  { %26 = dma.hbm_to_smem %s1560_s4, 32, %s1196_s0, [#allocation2] }
  0x28   :  { %p1075_p3 = scmp.ne.s32.totalorder %s1561_s5, %s1074_s14  ;;  %p1078_p4 = scmp.lt.u32.totalorder %s1074_s14, %s1561_s5 }
  0x2a   :  { %p1080_p5 = pnand %p1078_p4, %p1075_p3 }
  0x2c   :  { %1083 = shalt.err (!%p1080_p5)  }
  0x2d   :  { %s1197_s19 = smov [#allocation8]   ;;  %s1084_s23 = scalar_lea.hbm %s1562_s6, 32 }
  0x2e   :  { %28 = dma.hbm_to_smem %s1561_s5, 32, %s1197_s19, [#allocation2] }
  0x2f   :  { %p1085_p6 = scmp.ne.s32.totalorder %s1562_s6, %s1084_s23  ;;  %p1088_p7 = scmp.lt.u32.totalorder %s1084_s23, %s1562_s6 }
  0x31   :  { %p1090_p8 = pnand %p1088_p7, %p1085_p6 }
  0x33   :  { %1093 = shalt.err (!%p1090_p8)  }
  0x34   :  { %s1198_s27 = smov [#allocation9]  }
  0x35   :  { %30 = dma.hbm_to_smem %s1562_s6, 32, %s1198_s27, [#allocation2] }
  0x36   :  { %1154 = dma.done.wait [#allocation2], 224 }
  0x37   :  { %1155 = vsyncadd [#allocation2], 4294967072 }
  0x38   :  { %32 = sfence }
  0x39   :  { %33 = vsyncpa [#allocation11], 0 }
  0x3a   :  { %35 = vsyncpa [#allocation11 + $0x1], 0  ;;  %s1337_s5 = smov 0   ;;  %s1339_s30 = smov 0  }
  0x3b   :  { %s1341_s11 = smov 0   ;;  %s1343_s0 = smov 0  }
  0x3c   :  { %s1345_s12 = smov 0   ;;  %s1347_s1 = smov 0  }
  0x3d   :  { %s1349_s3 = smov 0   ;;  %s1351_s6 = smov 0  }
  0x3e LB: > { %1573 = sst [smem:[#allocation15_spill]] %s1162_s5  ;;  %s50_s13 = sadd.s32 1, %s1182_s1  ;;  %s1190_s6 = sphi %s1351_s6, %s41_s6   ;;  %s1186_s3 = sphi %s1349_s3, %s1593_s3   ;;  %s1182_s1 = sphi %s1347_s1, %s1592_s1   ;;  %s1178_s12 = sphi %s1345_s12, %s1591_s12   ;;  %s1174_s0 = sphi %s1343_s0, %s1590_s0   ;;  %s1170_s11 = sphi %s1341_s11, %s1589_s11   ;;  %s1166_s30 = sphi %s1339_s30, %s1595_s30   ;;  %s1162_s5 = sphi %s1337_s5, %s1594_s5  }
  0x3f   : > { %1574 = sst [smem:[#allocation16_spill]] %s1170_s11  ;;  %s53_s14 = sadd.s32 1, %s1186_s3 }
  0x40   : > { %1575 = sst [smem:[#allocation17_spill]] %s1182_s1  ;;  %p51_p9 = scmp.ge.s32.totalorder %s50_s13, 3 }
  0x41   : > { %1576 = sst [smem:[#allocation18_spill]] %s1186_s3  ;;  %s199_s15 = sshra.s32 %s1182_s1, 7 }
  0x42   : > { %1577 = sst [smem:[#allocation19_spill]] %s1190_s6  ;;  %s201_s16 = sadd.s32 %s1186_s3, %s199_s15 }
  0x43   : > { %s204_s17 = sand.u32 127, %s1182_s1  ;;  %s1597_s13 = smov (%p51_p9, %s50_s13), 0 }
  0x44   : > { %1578 = sst [smem:[#allocation20_spill]] %s1597_s13  ;;  %s1599_s14 = smov (!%p51_p9, %s53_s14), %s1186_s3 }
  0x45   : > { %s874_s18 = sadd.s32 4294967295, %s1190_s6   ;;  %s882_s19 = sshll.u32 %s201_s16, 7 }
  0x46   : > { %s875_s20 = sadd.s32 4294967294, %s1190_s6   ;;  %p55_p10 = scmp.ge.s32.totalorder %s1599_s14, 2 }
  0x47   : > { %s205_s21 = sadd.s32 %s882_s19, %s204_s17  ;;  %s207_s4 = sshra.s32 %s1597_s13, 7 }
  0x48   : > { %s1601_s14 = smov (%p55_p10, %s1599_s14), 0  ;;  %s212_s22 = sand.u32 127, %s1597_s13 }
  0x49   : > { %1579 = sst [smem:[#allocation21_spill]] %s1601_s14  ;;  %p230_p11 = scmp.ne.s32.totalorder %s1170_s11, %s1166_s30 }
  0x4a   : > { %s206_s23 = sld [smem:[#allocation3 + %s205_s21]]  ;;  %s209_s24 = sadd.s32 %s207_s4, %s1601_s14 }
  0x4b   : > { %s883_s25 = sshll.u32 %s209_s24, 7  ;;  %p231_p12 = scmp.eq.s32.totalorder %s874_s18, 5 }
  0x4c   : > { %s213_s2 = sadd.s32 %s883_s25, %s212_s22  ;;  %p236_p13 = scmp.ne.s32.totalorder %s1166_s30, %s1162_s5 }
  0x4d   : > { %s214_s26 = sld [smem:[#allocation3 + %s213_s2]]  ;;  %p1396_p0 = por %p231_p12, %p230_p11 }
  0x4e   : > { %p237_p1 = scmp.eq.s32.totalorder %s875_s20, 5  ;;  %p886_p2 = scmp.ge.s32.totalorder %s1190_s6, 1 }
  0x4f   : > { %p342_p3 = scmp.lt.s32.totalorder %s1190_s6, 7  ;;  %s215_s29 = ssub.s32 %s1186_s3, %s1601_s14 }
  0x50   : > { %p1402_p4 = por %p237_p1, %p236_p13  ;;  %s220_s17 = sadd.s32 1, %s1170_s11 }
  0x51   : > { %p343_p5 = pnand %p886_p2, %p342_p3 }
  0x52   : > { %s1581_s28 = scalar_select %p1402_p4, 1, 0 }
  0x53   : > { %s216_s15 = ssub.s32 %s206_s23, %s214_s26  ;;  %346 = sbr.rel (%p343_p5) target bundleno = 1069 (0x42d), region = 32 }
  0x54   : > { %1582 = sst [smem:[#allocation22_spill]] %s1581_s28  ;;  %s217_s16 = sor.u32 %s216_s15, %s215_s29 }
  0x55   : > { %p218_p6 = scmp.eq.s32.totalorder %s217_s16, 0  ;;  %s1563_s19 = sand.u32 (!%p343_p5), 1, %s1166_s30  }
  0x56   : > { %s888_s20 = sshll.u32 (!%p343_p5), %s1178_s12, 7  ;;  %s1416_s21 = sshll.u32 (!%p343_p5), %s1563_s19, 3 }
  0x57   : > { %s1410_s18 = scalar_select %p218_p6, %s1170_s11, %s220_s17  }
  0x58   : > { %s407_s4 = sld [smem:[#allocation7 + %s888_s20]] (!%p343_p5)  ;;  %s433_s23 = sadd.s32 (!%p343_p5), 1, %s888_s20 }
  0x59   : > { %1583 = sst [smem:[#allocation23_spill]] %s1410_s18  ;;  %s1420_s2 = sadd.s32 (!%p343_p5), 2, %s888_s20 }
  0x5a   : > { %s408_s22 = sld [smem:[#allocation8 + %s888_s20]]  ;;  %s493_s16 = sshra.s32 %s1174_s0, 7 }
  0x5b   : > { %s1418_s24 = sld [smem:[#allocation7 + %s433_s23]]  ;;  %s498_s17 = sand.u32 127, %s1174_s0 }
  0x5c   : > { %s414_s25 = sld [smem:[#allocation9 + %s888_s20]]  ;;  %s495_s14 = sadd.s32 %s1178_s12, %s493_s16 }
  0x5d   : > { %s435_s26 = sld [smem:[#allocation8 + %s433_s23]]  ;;  %s894_s13 = sshll.u32 %s495_s14, 7 }
  0x5e   : > { %s441_s29 = sld [smem:[#allocation9 + %s433_s23]]  ;;  %p409_p7 = scmp.gt.s32.totalorder %s407_s4, %s1174_s0 }
  0x5f   : > { %s1424_s15 = sld [smem:[#allocation7 + %s1420_s2]]  ;;  %s1435_s18 = sadd.s32 %s894_s13, %s498_s17 }
  0x60   : > { %s410_s19 = scalar_select %p409_p7, %s407_s4, %s1174_s0 }
  0x61   : > { %p436_p8 = scmp.gt.s32.totalorder %s1418_s24, %s1174_s0  ;;  %s461_s20 = sld [smem:[#allocation8 + %s1420_s2]] }
  0x62   : > { %p411_p9 = scmp.lt.s32.totalorder %s408_s22, %s410_s19  ;;  %s1438_s11 = sld [smem:[#allocation3 + %s1435_s18]] }
  0x63   : > { %s437_s3 = scalar_select %p436_p8, %s1418_s24, %s1174_s0 }
  0x64   : > { %s1603_s22 = smov (!%p411_p9, %s408_s22), %s410_s19  ;;  %s501_s16 = sld [smem:[#allocation4 + %s1435_s18]] }
  0x65   : > { %p438_p10 = scmp.lt.s32.totalorder %s435_s26, %s437_s3  ;;  %s413_s1 = ssub.s32 %s1603_s22, %s407_s4 }
  0x66   : > { %s415_s23 = sadd.s32 %s414_s25, %s413_s1  ;;  %s1442_s19 = sld [smem:[#allocation5 + %s1435_s18]] }
  0x67   : > { %s416_s14 = smul.u32 3, %s415_s23  ;;  %s1605_s26 = smov (!%p438_p10, %s435_s26), %s437_s3 }
  0x68   : > { %s440_s28 = ssub.s32 %s1605_s26, %s1418_s24  ;;  %s1446_s13 = sld [smem:[#allocation6 + %s1435_s18]] }
  0x69   : > { %p417_p11 = scmp.lt.s32.totalorder %s416_s14, 2  ;;  %s442_s4 = sadd.s32 %s441_s29, %s440_s28 }
  0x6a   : > { %p462_p12 = scmp.gt.s32.totalorder %s1424_s15, %s1174_s0  ;;  %p443_p13 = scmp.lt.s32.totalorder %s442_s4, 0 }
  0x6b   : > { %s1607_s14 = smov (!%p417_p11, %s416_s14), 2  ;;  %s467_s23 = sld [smem:[#allocation9 + %s1420_s2]] }
  0x6c   : > { %s889_s22 = sshll.u32 %s1607_s14, 2  ;;  %s1609_s4 = smov (!%p443_p13, %s442_s4), 0 }
  0x6d   : > { %s420_s17 = scalar_lea.vmem %s1553_s7, %s889_s22  ;;  %s891_s5 = sshll.u32 %s1609_s4, 2 }
  0x6e   : > { %s463_s3 = scalar_select %p462_p12, %s1424_s15, %s1174_s0 }
  0x6f   : > { %p506_p1 = scmp.eq.s32.totalorder %s1446_s13, 1  ;;  %s1460_s6 = scalar_lea.vmem %s1554_s8, %s891_s5 }
  0x70   : > { %p464_p2 = scmp.lt.s32.totalorder %s461_s20, %s463_s3  ;;  %s1469_s0 = scalar_lea.vmem [#allocation10], %s1416_s21 }
  0x71   : > { %p895_p5 = scmp.ne.s32.totalorder %s501_s16, 1 }
  0x72   : > { %s1611_s20 = smov (!%p464_p2, %s461_s20), %s463_s3  ;;  %vm510_vm0 = vcmask (!%p895_p5), 64512   ;;  %v1199_v0 = vmov (!%p895_p5), 0.0  }
  0x73   : > { %s466_s28 = ssub.s32 %s1611_s20, %s1424_s15  ;;  %509 = sbr.rel (%p895_p5) target bundleno = 122 (0x7a), region = 36  ;;  %511 = vst.msk [vmem:[%s1469_s0] sm:$0xff] (!%p895_p5), %vm510_vm0, %v1199_v0 }
  0x74   : > { %s468_s29 = sadd.s32 %s467_s23, %s466_s28 }
  0x75   : > { %p469_p3 = scmp.lt.s32.totalorder %s468_s29, 0 }
  0x77   : > { %s1613_s29 = smov (!%p469_p3, %s468_s29), 0 }
  0x78   : > { %s893_s14 = sshll.u32 %s1613_s29, 2 }
  0x79   : > { %s1466_s2 = scalar_lea.vmem %s1555_s9, %s893_s14 }
  0x7a PF: > { %p512_p6 = scmp.eq.s32.totalorder %s1438_s11, 0 }
  0x7c   : > { %p513_p7 = pnand %p512_p6, %p506_p1 }
  0x7d   : > { %v517_v1 = vld [vmem:[%s420_s17] sm:$0xff] (!%p513_p7)  ;;  %v1020_v2 = vld [vmem:[%s420_s17 + $0x8] ss:$0 sps:$4 sm:$0xff] (!%p513_p7)   ;;  %v1200_v3 = vmov (!%p513_p7), 0.0   ;;  %vm1201_vm1 = vmmov (!%p513_p7), 0   ;;  %vm612_vm2 = vcmask (!%p513_p7), 64512  }
  0x7e   : > { %516 = sbr.rel (%p513_p7) target bundleno = 353 (0x161), region = 40  ;;  %911 = vmatprep.subr.bf16.mxu1 (!%p513_p7), %v1200_v3  ;;  %v897_v4 = vcombine.high (!%p513_p7), %v517_v1, %v517_v1  ;;  %v896_v5 = vcombine.low (!%p513_p7), %v517_v1, %v517_v1  ;;  %913 = vmatprep.mubr.msk.bf16.mxu1 (!%p513_p7), %vm1201_vm1, %v1200_v3  ;;  %v519_v8 = vld [vmem:[%s1469_s0] sm:$0xff] (!%p513_p7) }
  0x7f   : > { %912 = vmatpush3.bf16.xpose.msra.mxu1 (!%p513_p7), %v1020_v2 }
  0x80   : > { %531 = vmatprep.subr.bf16.mxu0 (!%p513_p7), %v897_v4  ;;  %563 = vmatprep.mubr.bf16.mxu0 (!%p513_p7), %v897_v4 }
  0x81   : > { %532 = vmatpush1.bf16.xpose.msra.mxu0 (!%p513_p7), %v896_v5 }
  0x86   : > { %914 = vmatmul.mubr.bf16.vlgmr.msra.gmra.mrb[0].mxu1 %v1020_v2 }
  0x88   : > { %564 = vmatmul.mubr.bf16.vlgmr.msra.gmra.mrb[0].mxu0 %v896_v5 }
 0x159   : > { %v605_v6 = vpop.f32.mrb[0].mxu1 }
 0x15a   : > { %v915_v7 = vpop.f32.mrb[1].mxu1 }
 0x15b   : > { %v565_v9 = vpop.f32.mrb[0].mxu0  ;;  %v608_v10 = vpop.f32.mrb[2].mxu1 }
 0x15c   : > { %v606_v11 = vadd.f32 %v605_v6, %v565_v9  ;;  %v567_v12 = vpop.f32.mrb[1].mxu0  ;;  %v916_v13 = vpop.f32.mrb[3].mxu1 }
 0x15d   : > { %v568_v14 = vpop.f32.mrb[2].mxu0 }
 0x15e   : > { %v611_v15 = vadd.f32 %v606_v11, %v519_v8  ;;  %v569_v16 = vpop.f32.mrb[3].mxu0 }
 0x160   : > { %613 = vst.msk [vmem:[%s1469_s0] sm:$0xff] %vm612_vm2, %v611_v15 }
 0x161 PF: > { %p614_p8 = scmp.eq.s32.totalorder %s1438_s11, 1 }
 0x163   : > { %p615_p9 = pnand %p614_p8, %p506_p1 }
 0x164   : > { %v619_v17 = vld [vmem:[%s1460_s6] sm:$0xf] (!%p615_p9)  ;;  %v1202_v18 = vmov (!%p615_p9), 0.0   ;;  %vm1203_vm3 = vmmov (!%p615_p9), 0   ;;  %vm662_vm4 = vcmask (!%p615_p9), 64512  }
 0x165   : > { %618 = sbr.rel (%p615_p9) target bundleno = 580 (0x244), region = 44  ;;  %917 = vmatprep.subr.bf16.mxu0 (!%p615_p9), %v1202_v18  ;;  %919 = vmatprep.mubr.msk.bf16.mxu0 (!%p615_p9), %vm1203_vm3, %v1202_v18 }
 0x166   : > { %918 = vmatpush3.bf16.xpose.msra.mxu0 (!%p615_p9), %v619_v17 }
 0x167   : > { %v620_v19 = vld [vmem:[%s1469_s0] sm:$0xff] (!%p615_p9) }
 0x16d   : > { %920 = vmatmul.mubr.bf16.vlgmr.msra.gmra.mrb[0].mxu0 %v619_v17 }
 0x240   : > { %v655_v20 = vpop.f32.mrb[0].mxu0 }
 0x241   : > { %v661_v21 = vadd.f32 %v655_v20, %v620_v19  ;;  %v921_v22 = vpop.f32.mrb[1].mxu0 }
 0x242   : > { %v658_v23 = vpop.f32.mrb[2].mxu0 }
 0x243   : > { %663 = vst.msk [vmem:[%s1469_s0] sm:$0xff] %vm662_vm4, %v661_v21  ;;  %v922_v24 = vpop.f32.mrb[3].mxu0 }
 0x244 PF: > { %p664_p10 = scmp.eq.s32.totalorder %s1438_s11, 2 }
 0x246   : > { %p665_p11 = pnand %p664_p10, %p506_p1 }
 0x247   : > { %v669_v25 = vld [vmem:[%s1466_s2] sm:$0xf] (!%p665_p11)  ;;  %v1204_v26 = vmov (!%p665_p11), 0.0   ;;  %vm1205_vm5 = vmmov (!%p665_p11), 0   ;;  %vm712_vm6 = vcmask (!%p665_p11), 64512  }
 0x248   : > { %668 = sbr.rel (%p665_p11) target bundleno = 807 (0x327), region = 48  ;;  %923 = vmatprep.subr.bf16.mxu0 (!%p665_p11), %v1204_v26  ;;  %925 = vmatprep.mubr.msk.bf16.mxu0 (!%p665_p11), %vm1205_vm5, %v1204_v26 }
 0x249   : > { %924 = vmatpush3.bf16.xpose.msra.mxu0 (!%p665_p11), %v669_v25 }
 0x24a   : > { %v670_v27 = vld [vmem:[%s1469_s0] sm:$0xff] (!%p665_p11) }
 0x250   : > { %926 = vmatmul.mubr.bf16.vlgmr.msra.gmra.mrb[0].mxu0 %v669_v25 }
 0x323   : > { %v705_v28 = vpop.f32.mrb[0].mxu0 }
 0x324   : > { %v711_v29 = vadd.f32 %v705_v28, %v670_v27  ;;  %v927_v30 = vpop.f32.mrb[1].mxu0 }
 0x325   : > { %v708_v31 = vpop.f32.mrb[2].mxu0 }
 0x326   : > { %713 = vst.msk [vmem:[%s1469_s0] sm:$0xff] %vm712_vm6, %v711_v29  ;;  %v928_v32 = vpop.f32.mrb[3].mxu0 }
 0x327 PF: > { %p899_p12 = scmp.ne.s32.totalorder %s1442_s19, 1 }
 0x328   : > { %v718_v33 = vlaneseq (!%p899_p12)  ;;  %vm724_vm7 = vcmask (!%p899_p12), 64512   ;;  %vm737_vm9 = vcmask (!%p899_p12), 57344  }
 0x329   : > { %716 = sbr.rel (%p899_p12) target bundleno = 1041 (0x411), region = 52 }
 0x32a   : > { %v719_v35 = vshrl.u32 (!%p899_p12), %v718_v33, 7  ;;  %v721_v36 = vand.u32 (!%p899_p12), 127, %v718_v33 }
 0x32c   : > { %vm722_vm8 = vcmp.eq.s32.totalorder (!%p899_p12), %v719_v35, %v721_v36 }
 0x32d   : > { %v717_v34 = vld [vmem:[%s1469_s0] sm:$0xff] (!%p899_p12) }
 0x32e   : > { %v723_v37 = vsel (!%p899_p12), %vm722_vm8, 0.0, %v717_v34 }
 0x32f   : > { %v725_v38 = vsel (!%p899_p12), %vm724_vm7, %v723_v37, 0.0 }
 0x330   : > { %v726_v39 = vrot.slane %v725_v38, 4 }
 0x332   : > { %v727_v40 = vadd.f32 %v726_v39, %v725_v38 }
 0x334   : > { %v728_v41 = vrot.slane %v727_v40, 2 }
 0x336   : > { %v729_v42 = vadd.f32 %v728_v41, %v727_v40 }
 0x338   : > { %v730_v43 = vrot.slane %v729_v42, 1 }
 0x33a   : > { %v731_v44 = vadd.f32 %v730_v43, %v729_v42 }
 0x33c   : > { %v733_v45 = vmul.f32 0.125, %v731_v44 }
 0x33e   : > { %v738_v46 = vsel %vm737_vm9, %v733_v45, 0.0  ;;  %v750_v47 = vsub.f32 %v723_v37, %v733_v45 }
 0x33f   : > { %739 = vadd.xlane.f32.xlu0 %v738_v46 }
 0x343   : > { %734 = vadd.xlane.f32.xlu0 %v725_v38 }
 0x3cc   : > { %v740_v48 = vpop.xlane.xlu0 %739 }
 0x3cd   : > { %v741_v49 = vrot.slane %v740_v48, 4 }
 0x3cf   : > { %v742_v50 = vadd.f32 %v741_v49, %v740_v48 }
 0x3d0   : > { %v735_v55 = vpop.xlane.xlu0 %734 }
 0x3d1   : > { %v743_v51 = vrot.slane %v742_v50, 2  ;;  %v736_v56 = vmul.f32 0.125, %v735_v55 }
 0x3d3   : > { %v744_v52 = vadd.f32 %v743_v51, %v742_v50  ;;  %v751_v57 = vsub.f32 %v750_v47, %v736_v56 }
 0x3d5   : > { %v745_v53 = vrot.slane %v744_v52, 1 }
 0x3d7   : > { %v746_v54 = vadd.f32 %v745_v53, %v744_v52 }
 0x3d9   : > { %929 = vpush %v746_v54 }
 0x40a   : > { %s930_s5 = spop %929 }
 0x40b   : > { %v748_v58 = vstv %s930_s5 }
 0x40c   : > { %v749_v59 = vmul.f32 0.125, %v748_v58 }
 0x40e   : > { %v752_v60 = vadd.f32 %v751_v57, %v749_v59 }
 0x410   : > { %753 = vst.msk [vmem:[%s1469_s0] sm:$0xff] %vm724_vm7, %v752_v60 }
 0x411 PF: > { %s932_s11 = scalar_select %p1396_p0, [#allocation3], [#allocation12] }
 0x412   : > { %s1615_s18 = smov (!%p1396_p0, %s1435_s18), 0  ;;  %s931_s21 = smul.u32 3, %s1178_s12 }
 0x413   : > { %s769_s6 = sld [smem:[%s932_s11 + %s1615_s18]]  ;;  %s778_s15 = sshll.u32 %s1469_s0, 4  ;;  %s1501_s15 = int_to_ptr.vmem [resolvable:$true] %s778_s15 }
 0x414   : > { %s1584_s22 = sand.u32 1, %s1166_s30   ;;  %s1094_s23 = scalar_lea.vmem %s1501_s15, 128 }
 0x415   : > { %s755_s17 = scalar_lea.sflag [#allocation11], %s1584_s22  ;;  %p1095_p13 = scmp.ne.s32.totalorder %s1501_s15, %s1094_s23 }
 0x416   : > { %s1206_s12 = smov [#allocation10]  }
 0x417   : > { %p1096_p1 = pnand %p1095_p13, %p1396_p0  ;;  %s1098_s18 = sshll.u32 %s1206_s12, 4  ;;  %s1099_s18 = int_to_ptr.vmem [resolvable:$false] %s1098_s18 }
 0x418   : > { %s1100_s3 = scalar_lea.vmem %s1099_s18, 256  ;;  %p1101_p3 = scmp.lt.s32.totalorder %s1501_s15, %s1099_s18 }
 0x419   : > { %s774_s20 = sadd.s32 %s931_s21, %s769_s6  ;;  %p1097_p2 = pneg %p1096_p1 }
 0x41a   : > { %s902_s16 = sshll.u32 %s774_s20, 7  ;;  %p1102_p5 = scmp.lt.s32.totalorder %s1100_s3, %s1094_s23 }
 0x41b   : > { %s776_s4 = scalar_lea.hbm %s1556_s10, %s902_s16 }
 0x41c   : > { %p1103_p6 = por %p1102_p5, %p1101_p3 }
 0x41e   : > { %p1104_p7 = pnand %p1103_p6, %p1097_p2 }
 0x420   : > { %1107 = shalt.err (!%p1104_p7)
}
 0x421   : > { %s1108_s24 = scalar_lea.hbm %s776_s4, 128  ;;  %s1112_s29 = scalar_lea.hbm %s1556_s10, 768 }
 0x422   : > { %p1109_p8 = scmp.ne.s32.totalorder %s776_s4, %s1108_s24  ;;  %p1113_p11 = scmp.lt.u32.totalorder %s776_s4, %s1556_s10 }
 0x423   : > { %p1114_p12 = scmp.lt.u32.totalorder %s1112_s29, %s1108_s24  ;;  %p1116_p1 = scmp.lt.u32.totalorder %s1108_s24, %s776_s4 }
 0x424   : > { %p1110_p9 = pnand %p1109_p8, %p1396_p0 }
 0x425   : > { %p1115_p13 = por %p1114_p12, %p1113_p11 }
 0x426   : > { %p1111_p10 = pneg %p1110_p9 }
 0x427   : > { %p1117_p3 = por %p1116_p1, %p1115_p13 }
 0x429   : > { %p1118_p2 = pnand %p1117_p3, %p1111_p10 }
 0x42b   : > { %1121 = shalt.err (!%p1118_p2)
}
 0x42c   : > { %934 = dma.vmem_to_hbm [thread:$0]  (%p1396_p0), %s1501_s15, 128, %s776_s4, %s755_s17  }
 0x42d PF: > { %s1585_s25 = sld [smem:[#allocation19_spill]]  ;;  %s1586_s2 = sld [smem:[#allocation15_spill]] }
 0x433   : > { %p940_p5 = scmp.ge.s32.totalorder %s1585_s25, 2  ;;  %s790_s5 = sand.u32 1, %s1586_s2  }
 0x434   : > { %s791_s11 = scalar_lea.sflag [#allocation11], %s790_s5 }
 0x435   : > { %p937_p6 = pnand %p940_p5, %p1402_p4 }
 0x437   : > { %1157 = dma.done.wait (!%p937_p6), %s791_s11, 128  }
 0x438   : > { %1159 = vsyncadd (!%p937_p6), %s791_s11, 4294967168  ;;  %s41_s6 = sadd.s32 1, %s1585_s25   ;;  %s1588_s21 = sld [smem:[#allocation16_spill]] }
 0x439   : > { %p38_p7 = scmp.ge.s32.totalorder %s41_s6, 8   ;;  %s1589_s11 = sld [smem:[#allocation23_spill]] }
 0x43a   : > { %s1590_s0 = sld [smem:[#allocation17_spill]]  ;;  %s1591_s12 = sld [smem:[#allocation18_spill]] }
 0x43b   : > { %s1592_s1 = sld [smem:[#allocation20_spill]]  ;;  %s1593_s3 = sld [smem:[#allocation21_spill]] }
 0x43c   : > { %s1594_s5 = smov %s1166_s30  ;;  %40 = sbr.rel (!%p38_p7) target bundleno = 62 (0x3e), region = 93 }
 0x43e   : > { %s1595_s30 = smov %s1588_s21 }
 0x443   :  { %796 = vsyncpa [#allocation11], 1 }
 0x444   :  { %798 = vsyncpa [#allocation11 + $0x1], 1 }

</bundles_post_ra>
